<compile_context>
chip_gen: v6e
topology: v6e:2x2x1
jax: 0.10.0
libtpu: 0.0.40
codegen_flags: <defaults>
</compile_context>

<pallas_src>
import functools
import math

import jax
import jax.numpy as jnp
from jax import lax
from jax.experimental import pallas as pl
from jax.experimental.pallas import tpu as pltpu

_VMEM_LIMIT = 48 * 1024 * 1024  # below v7x's 64 MiB physical, above 16/32 MiB scoped defaults


def _round_up(x, m):
    return ((x + m - 1) // m) * m


# ----------------------------------------------------------------------------
# Fused Q/K/V projection:  y_i = x_i @ W_i^T + b_i    (torch nn.Linear layout)
# Grid = (M tiles, K-contraction tiles); f32 accumulators; nt-form dot_general.
# ----------------------------------------------------------------------------
def _qkv_proj_kernel(xq_ref, xk_ref, xv_ref, wq_ref, wk_ref, wv_ref,
                     bq_ref, bk_ref, bv_ref,
                     q_out_ref, k_out_ref, v_out_ref,
                     q_acc, k_acc, v_acc):
    k_step = pl.program_id(1)

    @pl.when(k_step == 0)
    def _():
        q_acc[...] = jnp.zeros_like(q_acc)
        k_acc[...] = jnp.zeros_like(k_acc)
        v_acc[...] = jnp.zeros_like(v_acc)

    # (tm, tk) x (E, tk) contracting the last dims -> (tm, E); no weight .T.
    dn = (((1,), (1,)), ((), ()))
    q_acc[...] += lax.dot_general(xq_ref[...], wq_ref[...], dn,
                                  preferred_element_type=jnp.float32)
    k_acc[...] += lax.dot_general(xk_ref[...], wk_ref[...], dn,
                                  preferred_element_type=jnp.float32)
    v_acc[...] += lax.dot_general(xv_ref[...], wv_ref[...], dn,
                                  preferred_element_type=jnp.float32)

    @pl.when(k_step == pl.num_programs(1) - 1)
    def _():
        q_out_ref[...] = (q_acc[...] + bq_ref[...]).astype(q_out_ref.dtype)
        k_out_ref[...] = (k_acc[...] + bk_ref[...]).astype(k_out_ref.dtype)
        v_out_ref[...] = (v_acc[...] + bv_ref[...]).astype(v_out_ref.dtype)


def qkv_projection(xq, xk, xv, wq, wk, wv, bq, bk, bv, *, tm=256, tk=512):
    M, E = xq.shape
    tm = min(tm, M)
    tk = min(tk, E)
    M_pad = _round_up(M, tm)
    K_pad = _round_up(E, tk)

    if M_pad != M or K_pad != E:
        pad_x = lambda x: jnp.pad(x, ((0, M_pad - M), (0, K_pad - E)))
        xq, xk, xv = pad_x(xq), pad_x(xk), pad_x(xv)
    if K_pad != E:
        pad_w = lambda w: jnp.pad(w, ((0, 0), (0, K_pad - E)))
        wq, wk, wv = pad_w(wq), pad_w(wk), pad_w(wv)

    bq2, bk2, bv2 = bq.reshape(1, E), bk.reshape(1, E), bv.reshape(1, E)

    x_spec = pl.BlockSpec((tm, tk), lambda m, k: (m, k))
    w_spec = pl.BlockSpec((E, tk), lambda m, k: (0, k))
    b_spec = pl.BlockSpec((1, E), lambda m, k: (0, 0))
    o_spec = pl.BlockSpec((tm, E), lambda m, k: (m, 0))

    q_out, k_out, v_out = pl.pallas_call(
        _qkv_proj_kernel,
        out_shape=[jax.ShapeDtypeStruct((M_pad, E), jnp.float32)] * 3,
        grid_spec=pltpu.PrefetchScalarGridSpec(
            num_scalar_prefetch=0,
            grid=(M_pad // tm, K_pad // tk),
            in_specs=[x_spec, x_spec, x_spec,
                      w_spec, w_spec, w_spec,
                      b_spec, b_spec, b_spec],
            out_specs=[o_spec, o_spec, o_spec],
            scratch_shapes=[pltpu.VMEM((tm, E), jnp.float32)] * 3,
        ),
        compiler_params=pltpu.CompilerParams(
            dimension_semantics=("parallel", "arbitrary"),
            vmem_limit_bytes=_VMEM_LIMIT,
        ),
    )(xq, xk, xv, wq, wk, wv, bq2, bk2, bv2)

    if M_pad != M:
        q_out, k_out, v_out = q_out[:M], k_out[:M], v_out[:M]
    return q_out, k_out, v_out


# ----------------------------------------------------------------------------
# Flash attention (non-causal, online softmax), grid = (B*H, Q tiles, KV tiles).
# Scaling is folded into the q projection, so q is used as-is here.
# ----------------------------------------------------------------------------
def _flash_kernel(q_ref, k_ref, v_ref, o_ref, m_sc, l_sc, acc_sc,
                  *, seq_len, tkv, mask_kv):
    kv = pl.program_id(2)

    @pl.when(kv == 0)
    def _():
        m_sc[...] = jnp.full_like(m_sc, -jnp.inf)
        l_sc[...] = jnp.zeros_like(l_sc)
        acc_sc[...] = jnp.zeros_like(acc_sc)

    q = q_ref[0]          # (tq, D)
    k = k_ref[0]          # (tkv, D)
    v = v_ref[0]          # (tkv, D)

    # q @ k^T without materializing a transpose of k (nt-form MXU matmul).
    dn = (((1,), (1,)), ((), ()))
    s = lax.dot_general(q, k, dn, preferred_element_type=jnp.float32)  # (tq, tkv)

    if mask_kv:  # static: only traced when the KV axis was zero-padded
        col = lax.broadcasted_iota(jnp.int32, s.shape, 1)
        s = jnp.where(kv * tkv + col < seq_len, s, -jnp.inf)

    m_prev = m_sc[...]
    m_new = jnp.maximum(m_prev, s.max(axis=-1, keepdims=True))
    alpha = jnp.exp(m_prev - m_new)
    p = jnp.exp(s - m_new)
    l_sc[...] = alpha * l_sc[...] + p.sum(axis=-1, keepdims=True)
    acc_sc[...] = alpha * acc_sc[...] + jnp.dot(
        p, v, preferred_element_type=jnp.float32)
    m_sc[...] = m_new

    @pl.when(kv == pl.num_programs(2) - 1)
    def _():
        l = l_sc[...]
        inv = pl.reciprocal(l, approx=True)   # EUP slot
        inv = inv * (2.0 - l * inv)           # one Newton step -> f32 accuracy
        o_ref[0] = (acc_sc[...] * inv).astype(o_ref.dtype)


def flash_attention(q, k, v, *, tq=256, tkv=512):
    BH, S, D = q.shape
    tq = min(tq, S)
    tkv = min(tkv, S)
    S_q = _round_up(S, tq)
    S_kv = _round_up(S, tkv)

    if S_q != S:
        q = jnp.pad(q, ((0, 0), (0, S_q - S), (0, 0)))
    if S_kv != S:
        k = jnp.pad(k, ((0, 0), (0, S_kv - S), (0, 0)))
        v = jnp.pad(v, ((0, 0), (0, S_kv - S), (0, 0)))

    kern = functools.partial(_flash_kernel, seq_len=S, tkv=tkv,
                             mask_kv=(S_kv != S))
    return pl.pallas_call(
        kern,
        out_shape=jax.ShapeDtypeStruct((BH, S_q, D), jnp.float32),
        grid_spec=pltpu.PrefetchScalarGridSpec(
            num_scalar_prefetch=0,
            grid=(BH, S_q // tq, S_kv // tkv),
            in_specs=[
                pl.BlockSpec((1, tq, D), lambda b, qi, ki: (b, qi, 0)),
                pl.BlockSpec((1, tkv, D), lambda b, qi, ki: (b, ki, 0)),
                pl.BlockSpec((1, tkv, D), lambda b, qi, ki: (b, ki, 0)),
            ],
            out_specs=pl.BlockSpec((1, tq, D), lambda b, qi, ki: (b, qi, 0)),
            scratch_shapes=[
                pltpu.VMEM((tq, 1), jnp.float32),
                pltpu.VMEM((tq, 1), jnp.float32),
                pltpu.VMEM((tq, D), jnp.float32),
            ],
        ),
        compiler_params=pltpu.CompilerParams(
            dimension_semantics=("parallel", "parallel", "arbitrary"),
            vmem_limit_bytes=_VMEM_LIMIT,
        ),
    )(q, k, v)


# ----------------------------------------------------------------------------
# Output projection reading the head-major attention output directly:
#   y[b, t, :] = sum_h attn[b*H+h, t, :] @ W_o^T[h*Dh:(h+1)*Dh, :] + b_o
# Grid = (B, T tiles, H) with the head axis as the (innermost) contraction.
# This removes the inverse head-transpose entirely.
# ----------------------------------------------------------------------------
def _out_proj_kernel(x_ref, w_ref, b_ref, o_ref, acc_ref):
    h = pl.program_id(2)

    @pl.when(h == 0)
    def _():
        acc_ref[...] = jnp.zeros_like(acc_ref)

    acc_ref[...] += jnp.dot(x_ref[0], w_ref[0],
                            preferred_element_type=jnp.float32)

    @pl.when(h == pl.num_programs(2) - 1)
    def _():
        o_ref[0] = (acc_ref[...] + b_ref[...]).astype(o_ref.dtype)


def out_projection(attn, o_w, o_b, *, batch, num_heads, tt):
    # attn: (B*H, T, Dh); o_w: (E, E) torch layout (out, in); o_b: (E,)
    BH, T, Dh = attn.shape
    B, H = batch, num_heads
    E = H * Dh
    w_r = o_w.T.reshape(H, Dh, E)   # per-head slices of W_o^T: (H, Dh, E)
    b2 = o_b.reshape(1, E)

    return pl.pallas_call(
        _out_proj_kernel,
        out_shape=jax.ShapeDtypeStruct((B, T, E), jnp.float32),
        grid_spec=pltpu.PrefetchScalarGridSpec(
            num_scalar_prefetch=0,
            grid=(B, T // tt, H),
            in_specs=[
                pl.BlockSpec((1, tt, Dh), lambda b, ti, h: (b * H + h, ti, 0)),
                pl.BlockSpec((1, Dh, E), lambda b, ti, h: (h, 0, 0)),
                pl.BlockSpec((1, E), lambda b, ti, h: (0, 0)),
            ],
            out_specs=pl.BlockSpec((1, tt, E), lambda b, ti, h: (b, ti, 0)),
            scratch_shapes=[pltpu.VMEM((tt, E), jnp.float32)],
        ),
        compiler_params=pltpu.CompilerParams(
            dimension_semantics=("parallel", "parallel", "arbitrary"),
            vmem_limit_bytes=_VMEM_LIMIT,
        ),
    )(attn, w_r, b2)


# ----------------------------------------------------------------------------
# Full module forward
# ----------------------------------------------------------------------------
def multihead_attention_with_flash(params, query, key, value, num_heads):
    B, T, E = query.shape
    head_dim = E // num_heads
    scaling = head_dim ** (-0.5)

    # Fold the attention scale into the q projection (no per-KV-step scaling).
    wq = params["q_w"] * scaling
    bq = params["q_b"] * scaling

    q2d, k2d, v2d = qkv_projection(
        query.reshape(B * T, E), key.reshape(B * T, E), value.reshape(B * T, E),
        wq, params["k_w"], params["v_w"], bq, params["k_b"], params["v_b"])

    # Head split (forward transpose kept in XLA for layout robustness).
    # TODO(synk): write the QKV projection output directly in (B, H, T, Dh) to
    # drop this transpose once head_dim is lane-dense (>=128).
    def to_heads(x2d):
        return (x2d.reshape(B, T, num_heads, head_dim)
                   .transpose(0, 2, 1, 3)
                   .reshape(B * num_heads, T, head_dim))

    qh, kh, vh = to_heads(q2d), to_heads(k2d), to_heads(v2d)

    tq = min(256, T)
    tkv = min(512, T)
    attn = flash_attention(qh, kh, vh, tq=tq, tkv=tkv)   # (B*H, T_pad, Dh)

    out = out_projection(attn, params["o_w"], params["o_b"],
                         batch=B, num_heads=num_heads, tt=tq)
    return out[:, :T, :]


# ----------------------------------------------------------------------------
# Reference (pure JAX) for a sanity check
# ----------------------------------------------------------------------------
def reference_forward(params, query, key, value, num_heads):
    B, T, E = query.shape
    head_dim = E // num_heads
    scaling = head_dim ** (-0.5)

    def lin(x, w, b):
        return x @ w.T + b

    q = lin(query, params["q_w"], params["q_b"]) * scaling
    k = lin(key, params["k_w"], params["k_b"])
    v = lin(value, params["v_w"], params["v_b"])

    def to_heads(x):
        return x.reshape(B, T, num_heads, head_dim).transpose(0, 2, 1, 3)

    qh, kh, vh = to_heads(q), to_heads(k), to_heads(v)
    s = jnp.einsum("bhqd,bhkd->bhqk", qh, kh)
    p = jax.nn.softmax(s, axis=-1)
    o = jnp.einsum("bhqk,bhkd->bhqd", p, vh)
    o = o.transpose(0, 2, 1, 3).reshape(B, T, E)
    return lin(o, params["o_w"], params["o_b"])


def init_params(key, embed_dim):
    bound = 1.0 / math.sqrt(embed_dim)
    names = ["q", "k", "v", "o"]
    keys = jax.random.split(key, 2 * len(names))
    params = {}
    for i, n in enumerate(names):
        params[f"{n}_w"] = jax.random.uniform(
            keys[2 * i], (embed_dim, embed_dim), jnp.float32, -bound, bound)
        params[f"{n}_b"] = jax.random.uniform(
            keys[2 * i + 1], (embed_dim,), jnp.float32, -bound, bound)
    return params


if __name__ == "__main__":
    B, T, E, H = 2, 8, 32, 4

    root = jax.random.PRNGKey(0)
    kp, kq, kk, kv = jax.random.split(root, 4)
    params = init_params(kp, E)
    query = jax.random.normal(kq, (B, T, E), jnp.float32)
    key_in = jax.random.normal(kk, (B, T, E), jnp.float32)
    value = jax.random.normal(kv, (B, T, E), jnp.float32)

    out = multihead_attention_with_flash(params, query, key_in, value, H)
    out = jax.block_until_ready(out)

    ref = reference_forward(params, query, key_in, value, H)
    assert out.shape == (B, T, E)
    assert jnp.allclose(out, ref, atol=1e-3, rtol=1e-3), "mismatch vs reference"

    print("KERNEL_OK")
</pallas_src>

<mosaic_0001>
module attributes {stable_mosaic.version = 11 : i64} {
  func.func @_qkv_proj_kernel(%arg0: i32, %arg1: i32, %arg2: memref<16x32xf32, #tpu.memory_space<vmem>>, %arg3: memref<16x32xf32, #tpu.memory_space<vmem>>, %arg4: memref<16x32xf32, #tpu.memory_space<vmem>>, %arg5: memref<32x32xf32, #tpu.memory_space<vmem>>, %arg6: memref<32x32xf32, #tpu.memory_space<vmem>>, %arg7: memref<32x32xf32, #tpu.memory_space<vmem>>, %arg8: memref<1x32xf32, #tpu.memory_space<vmem>>, %arg9: memref<1x32xf32, #tpu.memory_space<vmem>>, %arg10: memref<1x32xf32, #tpu.memory_space<vmem>>, %arg11: memref<16x32xf32, #tpu.memory_space<vmem>>, %arg12: memref<16x32xf32, #tpu.memory_space<vmem>>, %arg13: memref<16x32xf32, #tpu.memory_space<vmem>>, %arg14: memref<16x32xf32, #tpu.memory_space<vmem>>, %arg15: memref<16x32xf32, #tpu.memory_space<vmem>>, %arg16: memref<16x32xf32, #tpu.memory_space<vmem>>) attributes {dimension_semantics = [#tpu.dimension_semantics<parallel>, #tpu.dimension_semantics<arbitrary>], iteration_bounds = array<i64: 1, 1>, scalar_prefetch = 0 : i64, scratch_operands = 3 : i64, tpu.core_type = #tpu.core_type<tc>, window_params = [{transform_indices = @transform_0, window_bounds = array<i64: 16, 32>}, {transform_indices = @transform_1, window_bounds = array<i64: 16, 32>}, {transform_indices = @transform_2, window_bounds = array<i64: 16, 32>}, {transform_indices = @transform_3, window_bounds = array<i64: 32, 32>}, {transform_indices = @transform_4, window_bounds = array<i64: 32, 32>}, {transform_indices = @transform_5, window_bounds = array<i64: 32, 32>}, {pipeline_mode = #tpu.pipeline_mode<synchronous>, transform_indices = @transform_6, window_bounds = array<i64: 1, 32>}, {pipeline_mode = #tpu.pipeline_mode<synchronous>, transform_indices = @transform_7, window_bounds = array<i64: 1, 32>}, {pipeline_mode = #tpu.pipeline_mode<synchronous>, transform_indices = @transform_8, window_bounds = array<i64: 1, 32>}, {transform_indices = @transform_9, window_bounds = array<i64: 16, 32>}, {transform_indices = @transform_10, window_bounds = array<i64: 16, 32>}, {transform_indices = @transform_11, window_bounds = array<i64: 16, 32>}]} {
    %c0_i32 = arith.constant 0 : i32
    %0 = arith.cmpi eq, %arg1, %c0_i32 : i32
    %1 = arith.extui %0 : i1 to i32
    %c0_i32_0 = arith.constant 0 : i32
    %2 = arith.cmpi ne, %1, %c0_i32_0 : i32
    scf.if %2 {
      %cst_28 = arith.constant 0.000000e+00 : f32
      %24 = vector.broadcast %cst_28 : f32 to vector<16x32xf32>
      %c0_29 = arith.constant 0 : index
      %c0_30 = arith.constant 0 : index
      %25 = vector.load %arg14[%c0_29, %c0_30] : memref<16x32xf32, #tpu.memory_space<vmem>>, vector<16x32xf32>
      tpu.vector_store %arg14[%c0_29, %c0_30], %24 {strides = array<i32>} : memref<16x32xf32, #tpu.memory_space<vmem>>, vector<16x32xf32>,
      %cst_31 = arith.constant 0.000000e+00 : f32
      %26 = vector.broadcast %cst_31 : f32 to vector<16x32xf32>
      %c0_32 = arith.constant 0 : index
      %c0_33 = arith.constant 0 : index
      %27 = vector.load %arg15[%c0_32, %c0_33] : memref<16x32xf32, #tpu.memory_space<vmem>>, vector<16x32xf32>
      tpu.vector_store %arg15[%c0_32, %c0_33], %26 {strides = array<i32>} : memref<16x32xf32, #tpu.memory_space<vmem>>, vector<16x32xf32>,
      %cst_34 = arith.constant 0.000000e+00 : f32
      %28 = vector.broadcast %cst_34 : f32 to vector<16x32xf32>
      %c0_35 = arith.constant 0 : index
      %c0_36 = arith.constant 0 : index
      %29 = vector.load %arg16[%c0_35, %c0_36] : memref<16x32xf32, #tpu.memory_space<vmem>>, vector<16x32xf32>
      tpu.vector_store %arg16[%c0_35, %c0_36], %28 {strides = array<i32>} : memref<16x32xf32, #tpu.memory_space<vmem>>, vector<16x32xf32>,
    } else {
    }
    %c0 = arith.constant 0 : index
    %c0_1 = arith.constant 0 : index
    %3 = vector.load %arg14[%c0, %c0_1] : memref<16x32xf32, #tpu.memory_space<vmem>>, vector<16x32xf32>
    %c0_2 = arith.constant 0 : index
    %c0_3 = arith.constant 0 : index
    %4 = vector.load %arg2[%c0_2, %c0_3] : memref<16x32xf32, #tpu.memory_space<vmem>>, vector<16x32xf32>
    %c0_4 = arith.constant 0 : index
    %c0_5 = arith.constant 0 : index
    %5 = vector.load %arg5[%c0_4, %c0_5] : memref<32x32xf32, #tpu.memory_space<vmem>>, vector<32x32xf32>
    %cst = arith.constant dense<0.000000e+00> : vector<16x32xf32>
    %6 = tpu.matmul %4, %5, %cst {dimension_numbers = #tpu.dot_dimension_numbers<[1], [1], [0], [0], [0, 0, 1, 0], [], []>} : vector<16x32xf32>, vector<32x32xf32>, vector<16x32xf32> -> vector<16x32xf32>
    %7 = arith.addf %3, %6 : vector<16x32xf32>
    %c0_6 = arith.constant 0 : index
    %c0_7 = arith.constant 0 : index
    %8 = vector.load %arg14[%c0_6, %c0_7] : memref<16x32xf32, #tpu.memory_space<vmem>>, vector<16x32xf32>
    tpu.vector_store %arg14[%c0_6, %c0_7], %7 {strides = array<i32>} : memref<16x32xf32, #tpu.memory_space<vmem>>, vector<16x32xf32>,
    %c0_8 = arith.constant 0 : index
    %c0_9 = arith.constant 0 : index
    %9 = vector.load %arg15[%c0_8, %c0_9] : memref<16x32xf32, #tpu.memory_space<vmem>>, vector<16x32xf32>
    %c0_10 = arith.constant 0 : index
    %c0_11 = arith.constant 0 : index
    %10 = vector.load %arg3[%c0_10, %c0_11] : memref<16x32xf32, #tpu.memory_space<vmem>>, vector<16x32xf32>
    %c0_12 = arith.constant 0 : index
    %c0_13 = arith.constant 0 : index
    %11 = vector.load %arg6[%c0_12, %c0_13] : memref<32x32xf32, #tpu.memory_space<vmem>>, vector<32x32xf32>
    %cst_14 = arith.constant dense<0.000000e+00> : vector<16x32xf32>
    %12 = tpu.matmul %10, %11, %cst_14 {dimension_numbers = #tpu.dot_dimension_numbers<[1], [1], [0], [0], [0, 0, 1, 0], [], []>} : vector<16x32xf32>, vector<32x32xf32>, vector<16x32xf32> -> vector<16x32xf32>
    %13 = arith.addf %9, %12 : vector<16x32xf32>
    %c0_15 = arith.constant 0 : index
    %c0_16 = arith.constant 0 : index
    %14 = vector.load %arg15[%c0_15, %c0_16] : memref<16x32xf32, #tpu.memory_space<vmem>>, vector<16x32xf32>
    tpu.vector_store %arg15[%c0_15, %c0_16], %13 {strides = array<i32>} : memref<16x32xf32, #tpu.memory_space<vmem>>, vector<16x32xf32>,
    %c0_17 = arith.constant 0 : index
    %c0_18 = arith.constant 0 : index
    %15 = vector.load %arg16[%c0_17, %c0_18] : memref<16x32xf32, #tpu.memory_space<vmem>>, vector<16x32xf32>
    %c0_19 = arith.constant 0 : index
    %c0_20 = arith.constant 0 : index
    %16 = vector.load %arg4[%c0_19, %c0_20] : memref<16x32xf32, #tpu.memory_space<vmem>>, vector<16x32xf32>
    %c0_21 = arith.constant 0 : index
    %c0_22 = arith.constant 0 : index
    %17 = vector.load %arg7[%c0_21, %c0_22] : memref<32x32xf32, #tpu.memory_space<vmem>>, vector<32x32xf32>
    %cst_23 = arith.constant dense<0.000000e+00> : vector<16x32xf32>
    %18 = tpu.matmul %16, %17, %cst_23 {dimension_numbers = #tpu.dot_dimension_numbers<[1], [1], [0], [0], [0, 0, 1, 0], [], []>} : vector<16x32xf32>, vector<32x32xf32>, vector<16x32xf32> -> vector<16x32xf32>
    %19 = arith.addf %15, %18 : vector<16x32xf32>
    %c0_24 = arith.constant 0 : index
    %c0_25 = arith.constant 0 : index
    %20 = vector.load %arg16[%c0_24, %c0_25] : memref<16x32xf32, #tpu.memory_space<vmem>>, vector<16x32xf32>
    tpu.vector_store %arg16[%c0_24, %c0_25], %19 {strides = array<i32>} : memref<16x32xf32, #tpu.memory_space<vmem>>, vector<16x32xf32>,
    %c0_i32_26 = arith.constant 0 : i32
    %21 = arith.cmpi eq, %arg1, %c0_i32_26 : i32
    %22 = arith.extui %21 : i1 to i32
    %c0_i32_27 = arith.constant 0 : i32
    %23 = arith.cmpi ne, %22, %c0_i32_27 : i32
    scf.if %23 {
      %c0_28 = arith.constant 0 : index
      %c0_29 = arith.constant 0 : index
      %24 = vector.load %arg14[%c0_28, %c0_29] : memref<16x32xf32, #tpu.memory_space<vmem>>, vector<16x32xf32>
      %c0_30 = arith.constant 0 : index
      %c0_31 = arith.constant 0 : index
      %25 = vector.load %arg8[%c0_30, %c0_31] : memref<1x32xf32, #tpu.memory_space<vmem>>, vector<1x32xf32>
      %26 = vector.broadcast %25 : vector<1x32xf32> to vector<16x32xf32>
      %27 = arith.addf %24, %26 : vector<16x32xf32>
      %c0_32 = arith.constant 0 : index
      %c0_33 = arith.constant 0 : index
      %28 = vector.load %arg11[%c0_32, %c0_33] : memref<16x32xf32, #tpu.memory_space<vmem>>, vector<16x32xf32>
      tpu.vector_store %arg11[%c0_32, %c0_33], %27 {strides = array<i32>} : memref<16x32xf32, #tpu.memory_space<vmem>>, vector<16x32xf32>,
      %c0_34 = arith.constant 0 : index
      %c0_35 = arith.constant 0 : index
      %29 = vector.load %arg15[%c0_34, %c0_35] : memref<16x32xf32, #tpu.memory_space<vmem>>, vector<16x32xf32>
      %c0_36 = arith.constant 0 : index
      %c0_37 = arith.constant 0 : index
      %30 = vector.load %arg9[%c0_36, %c0_37] : memref<1x32xf32, #tpu.memory_space<vmem>>, vector<1x32xf32>
      %31 = vector.broadcast %30 : vector<1x32xf32> to vector<16x32xf32>
      %32 = arith.addf %29, %31 : vector<16x32xf32>
      %c0_38 = arith.constant 0 : index
      %c0_39 = arith.constant 0 : index
      %33 = vector.load %arg12[%c0_38, %c0_39] : memref<16x32xf32, #tpu.memory_space<vmem>>, vector<16x32xf32>
      tpu.vector_store %arg12[%c0_38, %c0_39], %32 {strides = array<i32>} : memref<16x32xf32, #tpu.memory_space<vmem>>, vector<16x32xf32>,
      %c0_40 = arith.constant 0 : index
      %c0_41 = arith.constant 0 : index
      %34 = vector.load %arg16[%c0_40, %c0_41] : memref<16x32xf32, #tpu.memory_space<vmem>>, vector<16x32xf32>
      %c0_42 = arith.constant 0 : index
      %c0_43 = arith.constant 0 : index
      %35 = vector.load %arg10[%c0_42, %c0_43] : memref<1x32xf32, #tpu.memory_space<vmem>>, vector<1x32xf32>
      %36 = vector.broadcast %35 : vector<1x32xf32> to vector<16x32xf32>
      %37 = arith.addf %34, %36 : vector<16x32xf32>
      %c0_44 = arith.constant 0 : index
      %c0_45 = arith.constant 0 : index
      %38 = vector.load %arg13[%c0_44, %c0_45] : memref<16x32xf32, #tpu.memory_space<vmem>>, vector<16x32xf32>
      tpu.vector_store %arg13[%c0_44, %c0_45], %37 {strides = array<i32>} : memref<16x32xf32, #tpu.memory_space<vmem>>, vector<16x32xf32>,
    } else {
    }
    return
  }
  func.func @transform_0(%arg0: i32, %arg1: i32) -> (i32, i32) {
    %c0_i32 = arith.constant 0 : i32
    return %arg0, %arg1 : i32, i32
  }
  func.func @transform_1(%arg0: i32, %arg1: i32) -> (i32, i32) {
    %c0_i32 = arith.constant 0 : i32
    return %arg0, %arg1 : i32, i32
  }
  func.func @transform_2(%arg0: i32, %arg1: i32) -> (i32, i32) {
    %c0_i32 = arith.constant 0 : i32
    return %arg0, %arg1 : i32, i32
  }
  func.func @transform_3(%arg0: i32, %arg1: i32) -> (i32, i32) {
    %c0_i32 = arith.constant 0 : i32
    %c0_i32_0 = arith.constant 0 : i32
    return %c0_i32, %arg1 : i32, i32
  }
  func.func @transform_4(%arg0: i32, %arg1: i32) -> (i32, i32) {
    %c0_i32 = arith.constant 0 : i32
    %c0_i32_0 = arith.constant 0 : i32
    return %c0_i32, %arg1 : i32, i32
  }
  func.func @transform_5(%arg0: i32, %arg1: i32) -> (i32, i32) {
    %c0_i32 = arith.constant 0 : i32
    %c0_i32_0 = arith.constant 0 : i32
    return %c0_i32, %arg1 : i32, i32
  }
  func.func @transform_6(%arg0: i32, %arg1: i32) -> (i32, i32) {
    %c0_i32 = arith.constant 0 : i32
    %c0_i32_0 = arith.constant 0 : i32
    %c0_i32_1 = arith.constant 0 : i32
    return %c0_i32, %c0_i32_0 : i32, i32
  }
  func.func @transform_7(%arg0: i32, %arg1: i32) -> (i32, i32) {
    %c0_i32 = arith.constant 0 : i32
    %c0_i32_0 = arith.constant 0 : i32
    %c0_i32_1 = arith.constant 0 : i32
    return %c0_i32, %c0_i32_0 : i32, i32
  }
  func.func @transform_8(%arg0: i32, %arg1: i32) -> (i32, i32) {
    %c0_i32 = arith.constant 0 : i32
    %c0_i32_0 = arith.constant 0 : i32
    %c0_i32_1 = arith.constant 0 : i32
    return %c0_i32, %c0_i32_0 : i32, i32
  }
  func.func @transform_9(%arg0: i32, %arg1: i32) -> (i32, i32) {
    %c0_i32 = arith.constant 0 : i32
    %c0_i32_0 = arith.constant 0 : i32
    return %arg0, %c0_i32 : i32, i32
  }
  func.func @transform_10(%arg0: i32, %arg1: i32) -> (i32, i32) {
    %c0_i32 = arith.constant 0 : i32
    %c0_i32_0 = arith.constant 0 : i32
    return %arg0, %c0_i32 : i32, i32
  }
  func.func @transform_11(%arg0: i32, %arg1: i32) -> (i32, i32) {
    %c0_i32 = arith.constant 0 : i32
    %c0_i32_0 = arith.constant 0 : i32
    return %arg0, %c0_i32 : i32, i32
  }
}

</mosaic_0001>

<bundles_post_ra>
// kernel: tpu_custom_call.1
= control target key start
LH: loop header
LB: loop body
LE: loop exit
PB: predicated region body
PF: predicated region fallthrough
CT: control target
= control target key end

     0   :  { %17 = vsyncpa [#allocation6], 0  ;;  %s998_s0 = inlined_call_operand.hbm [shape: f32[16,32], index: 0, kind: input, shape index: {}]   ;;  %s999_s1 = inlined_call_operand.hbm [shape: f32[16,32], index: 1, kind: input, shape index: {}]   ;;  %s1000_s2 = inlined_call_operand.hbm [shape: f32[16,32], index: 2, kind: input, shape index: {}]   ;;  %s1001_s3 = inlined_call_operand.hbm [shape: f32[32,32], index: 3, kind: input, shape index: {}]   ;;  %s1002_s4 = inlined_call_operand.hbm [shape: f32[32,32], index: 4, kind: input, shape index: {}]   ;;  %s1003_s5 = inlined_call_operand.hbm [shape: f32[32,32], index: 5, kind: input, shape index: {}]   ;;  %s1004_s6 = inlined_call_operand.vmem [shape: f32[1,32], index: 6, kind: input, shape index: {}]   ;;  %s1005_s7 = inlined_call_operand.vmem [shape: f32[1,32], index: 7, kind: input, shape index: {}]   ;;  %s1006_s8 = inlined_call_operand.vmem [shape: f32[1,32], index: 8, kind: input, shape index: {}]   ;;  %s1007_s9 = inlined_call_operand.hbm [shape: f32[16,32], index: 9, kind: output, shape index: {0}]   ;;  %s1008_s10 = inlined_call_operand.hbm [shape: f32[16,32], index: 10, kind: output, shape index: {1}]   ;;  %s1009_s11 = inlined_call_operand.hbm [shape: f32[16,32], index: 11, kind: output, shape index: {2}]  }
   0x1   :  { %18 = vsyncpa [#allocation9], 0 }
   0x2   :  { %19 = vsyncpa [#allocation12], 0 }
   0x3   :  { %20 = vsyncpa [#allocation15], 0 }
   0x4   :  { %21 = vsyncpa [#allocation7], 0 }
   0x5   :  { %22 = vsyncpa [#allocation18], 0  ;;  %s815_s17 = smov [#allocation8]   ;;  %s816_s19 = smov [#allocation11]  }
   0x6   :  { %s40_s18 = sshll.u32 %s815_s17, 4  ;;  %s64_s20 = sshll.u32 %s816_s19, 4  ;;  %s41_s18 = int_to_ptr.vmem [resolvable:$true] %s40_s18  ;;  %s65_s20 = int_to_ptr.vmem [resolvable:$true] %s64_s20 }
   0x7   :  { %s631_s21 = scalar_lea.vmem %s41_s18, 256  ;;  %p636_p1 = scmp.lt.s32.totalorder %s41_s18, %s41_s18 }
   0x8   :  { %p632_p0 = scmp.ne.s32.totalorder %s41_s18, %s631_s21  ;;  %p637_p2 = scmp.lt.s32.totalorder %s631_s21, %s631_s21 }
   0xa   :  { %p638_p3 = por %p637_p2, %p636_p1 }
   0xc   :  { %p639_p4 = pnand %p638_p3, %p632_p0 }
   0xe   :  { %642 = shalt.err (!%p639_p4)
}
   0xf   :  { %s817_s22 = smov 128   ;;  %s818_s23 = smov 8  }
  0x10   :  { %46 = dma.hbm_to_vmem [thread:$0]  %s999_s1, 256, %s41_s18, [#allocation9], %s817_s22, %s817_s22, %s818_s23  }
  0x11   :  { %s651_s26 = scalar_lea.vmem %s65_s20, 512  ;;  %p656_p6 = scmp.lt.s32.totalorder %s65_s20, %s65_s20 }
  0x12   :  { %p652_p5 = scmp.ne.s32.totalorder %s65_s20, %s651_s26  ;;  %p657_p7 = scmp.lt.s32.totalorder %s651_s26, %s651_s26 }
  0x14   :  { %p658_p8 = por %p657_p7, %p656_p6 }
  0x16   :  { %p659_p9 = pnand %p658_p8, %p652_p5 }
  0x18   :  { %662 = shalt.err (!%p659_p9)
}
  0x19   :  { %70 = dma.hbm_to_vmem [thread:$0]  %s1001_s3, 512, %s65_s20, [#allocation12], %s817_s22, %s817_s22, %s818_s23  }
  0x1a   :  { %s819_s29 = smov [#allocation5]   ;;  %s820_s12 = smov [#allocation10]  }
  0x1b   :  { %s28_s30 = sshll.u32 %s819_s29, 4  ;;  %s52_s13 = sshll.u32 %s820_s12, 4  ;;  %s29_s30 = int_to_ptr.vmem [resolvable:$true] %s28_s30  ;;  %s53_s13 = int_to_ptr.vmem [resolvable:$true] %s52_s13 }
  0x1c   :  { %s671_s1 = scalar_lea.vmem %s29_s30, 256  ;;  %p676_p11 = scmp.lt.s32.totalorder %s29_s30, %s29_s30 }
  0x1d   :  { %p672_p10 = scmp.ne.s32.totalorder %s29_s30, %s671_s1  ;;  %p677_p12 = scmp.lt.s32.totalorder %s671_s1, %s671_s1 }
  0x1f   :  { %p678_p13 = por %p677_p12, %p676_p11 }
  0x21   :  { %p679_p0 = pnand %p678_p13, %p672_p10 }
  0x23   :  { %682 = shalt.err (!%p679_p0)
}
  0x24   :  { %34 = dma.hbm_to_vmem [thread:$0]  %s998_s0, 256, %s29_s30, [#allocation6], %s817_s22, %s817_s22, %s818_s23  }
  0x25   :  { %s691_s3 = scalar_lea.vmem %s53_s13, 256  ;;  %p696_p2 = scmp.lt.s32.totalorder %s53_s13, %s53_s13 }
  0x26   :  { %p692_p1 = scmp.ne.s32.totalorder %s53_s13, %s691_s3  ;;  %p697_p3 = scmp.lt.s32.totalorder %s691_s3, %s691_s3 }
  0x28   :  { %p698_p4 = por %p697_p3, %p696_p2 }
  0x2a   :  { %p699_p5 = pnand %p698_p4, %p692_p1 }
  0x2c   :  { %702 = shalt.err (!%p699_p5)
}
  0x2d   :  { %58 = dma.hbm_to_vmem [thread:$0]  %s1000_s2, 256, %s53_s13, [#allocation9], %s817_s22, %s817_s22, %s818_s23  }
  0x2e   :  { %s821_s18 = smov [#allocation13]   ;;  %s822_s20 = smov [#allocation14]  }
  0x2f   :  { %s76_s19 = sshll.u32 %s821_s18, 4  ;;  %s88_s21 = sshll.u32 %s822_s20, 4  ;;  %s77_s19 = int_to_ptr.vmem [resolvable:$true] %s76_s19  ;;  %s89_s21 = int_to_ptr.vmem [resolvable:$true] %s88_s21 }
  0x30   :  { %s711_s0 = scalar_lea.vmem %s77_s19, 512  ;;  %p716_p7 = scmp.lt.s32.totalorder %s77_s19, %s77_s19 }
  0x31   :  { %p712_p6 = scmp.ne.s32.totalorder %s77_s19, %s711_s0  ;;  %p717_p8 = scmp.lt.s32.totalorder %s711_s0, %s711_s0 }
  0x33   :  { %p718_p9 = por %p717_p8, %p716_p7 }
  0x35   :  { %p719_p10 = pnand %p718_p9, %p712_p6 }
  0x37   :  { %722 = shalt.err (!%p719_p10)
}
  0x38   :  { %82 = dma.hbm_to_vmem [thread:$0]  %s1002_s4, 512, %s77_s19, [#allocation12], %s817_s22, %s817_s22, %s818_s23  }
  0x39   :  { %s731_s2 = scalar_lea.vmem %s89_s21, 512  ;;  %p736_p12 = scmp.lt.s32.totalorder %s89_s21, %s89_s21 }
  0x3a   :  { %p732_p11 = scmp.ne.s32.totalorder %s89_s21, %s731_s2  ;;  %p737_p13 = scmp.lt.s32.totalorder %s731_s2, %s731_s2 }
  0x3c   :  { %p738_p0 = por %p737_p13, %p736_p12 }
  0x3e   :  { %p739_p1 = pnand %p738_p0, %p732_p11 }
  0x40   :  { %742 = shalt.err (!%p739_p1)
}
  0x41   :  { %94 = dma.hbm_to_vmem [thread:$0]  %s1003_s5, 512, %s89_s21, [#allocation15], %s817_s22, %s817_s22, %s818_s23  }
  0x42   :  { %803 = dma.done.wait [#allocation6], 256  }
  0x43   :  { %804 = vsyncadd [#allocation6], 4294967040 }
  0x44   :  { %805 = dma.done.wait [#allocation9], 512  }
  0x45   :  { %806 = vsyncadd [#allocation9], 4294966784 }
  0x46   :  { %807 = dma.done.wait [#allocation12], 1024  }
  0x47   :  { %808 = vsyncadd [#allocation12], 4294966272 }
  0x48   :  { %809 = dma.done.wait [#allocation15], 512  }
  0x49   :  { %810 = vsyncadd [#allocation15], 4294966784  ;;  %vm123_vm0 = vcmask 261120   ;;  %v823_v0 = vmov 0.0   ;;  %v137_v1 = vld [vmem:[#allocation11 + $0x18] sm:$0xff]  ;;  %v136_v2 = vld [vmem:[#allocation11 + $0x10] sm:$0xff] }
  0x4a   :  { %125 = vst.msk [vmem:[#allocation2 + $0x8] sm:$0xff] %vm123_vm0, %v823_v0  ;;  %124 = vst.msk [vmem:[#allocation2] sm:$0xff] %vm123_vm0, %v823_v0  ;;  %578 = vmatprep.subr.msk.mxu0 %vm123_vm0, %v137_v1  ;;  %v243_v3 = vld [vmem:[#allocation13 + $0x18] sm:$0xff]  ;;  %v132_v4 = vld [vmem:[#allocation5] sm:$0xff]  ;;  %s824_s30 = smov [#allocation16]   ;;  %s825_s13 = smov [#allocation17]  }
  0x4b   :  { %126 = vst.msk [vmem:[#allocation3] sm:$0xff] %vm123_vm0, %v823_v0  ;;  %127 = vst.msk [vmem:[#allocation3 + $0x8] sm:$0xff] %vm123_vm0, %v823_v0  ;;  %579 = vmatpush3.xpose.msk.msra.mxu0 %vm123_vm0, %v137_v1  ;;  %589 = vmatprep.subr.msk.mxu1 %vm123_vm0, %v243_v3  ;;  %v242_v5 = vld [vmem:[#allocation13 + $0x10] sm:$0xff]  ;;  %v135_v6 = vld [vmem:[#allocation11 + $0x8] sm:$0xff]  ;;  %s493_s12 = sshll.u32 %s824_s30, 4  ;;  %s505_s1 = sshll.u32 %s825_s13, 4  ;;  %s494_s12 = int_to_ptr.vmem [resolvable:$true] %s493_s12  ;;  %s506_s1 = int_to_ptr.vmem [resolvable:$true] %s505_s1 }
  0x4c   :  { %128 = vst.msk [vmem:[#allocation4] sm:$0xff] %vm123_vm0, %v823_v0  ;;  %129 = vst.msk [vmem:[#allocation4 + $0x8] sm:$0xff] %vm123_vm0, %v823_v0  ;;  %580 = vmatprep.subr.msk.mxu0 %vm123_vm0, %v136_v2  ;;  %590 = vmatpush3.xpose.msk.msra.mxu1 %vm123_vm0, %v243_v3  ;;  %v238_v7 = vld [vmem:[#allocation8] sm:$0xff]  ;;  %v241_v8 = vld [vmem:[#allocation13 + $0x8] sm:$0xff]  ;;  %p748_p3 = scmp.lt.s32.totalorder %s494_s12, %s494_s12 }
  0x4d   :  { %586 = vmatprep.mubr.msk.f32.mxu0 %vm123_vm0, %v132_v4  ;;  %591 = vmatprep.subr.msk.mxu1 %vm123_vm0, %v242_v5  ;;  %v134_v9 = vld [vmem:[#allocation11] sm:$0xff]  ;;  %v348_v11 = vld [vmem:[#allocation14 + $0x18] sm:$0xff]  ;;  %v239_v13 = vld [vmem:[#allocation8 + $0x8] sm:$0xff] }
  0x4e   :  { %597 = vmatprep.mubr.msk.f32.mxu1 %vm123_vm0, %v238_v7  ;;  %v240_v10 = vld [vmem:[#allocation13] sm:$0xff]  ;;  %v133_v12 = vld [vmem:[#allocation5 + $0x8] sm:$0xff]  ;;  %v347_v14 = vld [vmem:[#allocation14 + $0x10] sm:$0xff] }
  0x4f   :  { %581 = vmatpush3.xpose.msk.msra.mxu0 %vm123_vm0, %v136_v2  ;;  %v343_v15 = vld [vmem:[#allocation10] sm:$0xff]  ;;  %v346_v16 = vld [vmem:[#allocation14 + $0x8] sm:$0xff]  ;;  %v345_v17 = vld [vmem:[#allocation14] sm:$0xff] }
  0x50   :  { %582 = vmatprep.subr.msk.mxu0 %vm123_vm0, %v135_v6  ;;  %592 = vmatpush3.xpose.msk.msra.mxu1 %vm123_vm0, %v242_v5  ;;  %v344_v18 = vld [vmem:[#allocation10 + $0x8] sm:$0xff]  ;;  %v557_v31 = vld [vmem:[%s1004_s6] ss:$0 sm:$0xff]  ;;  %s743_s6 = scalar_lea.vmem %s494_s12, 256 }
  0x51   :  { %593 = vmatprep.subr.msk.mxu1 %vm123_vm0, %v241_v8  ;;  %v131_v19 = vld [vmem:[#allocation2 + $0x8] sm:$0xff]  ;;  %v130_v22 = vld [vmem:[#allocation2] sm:$0xff]  ;;  %p744_p2 = scmp.ne.s32.totalorder %s494_s12, %s743_s6  ;;  %p749_p4 = scmp.lt.s32.totalorder %s743_s6, %s743_s6 }
  0x52   :  { %v237_v20 = vld [vmem:[#allocation3 + $0x8] sm:$0xff]  ;;  %v236_v25 = vld [vmem:[#allocation3] sm:$0xff]  ;;  %v558_v32 = vld [vmem:[%s1005_s7] ss:$0 sm:$0xff] }
  0x53   :  { %583 = vmatpush3.xpose.msk.msra.mxu0 %vm123_vm0, %v135_v6  ;;  %v342_v40 = vld [vmem:[#allocation4 + $0x8] sm:$0xff]  ;;  %v341_v43 = vld [vmem:[#allocation4] sm:$0xff]  ;;  %p750_p5 = por %p749_p4, %p748_p3 }
  0x54   :  { %584 = vmatprep.subr.msk.mxu0 %vm123_vm0, %v134_v9  ;;  %594 = vmatpush3.xpose.msk.msra.mxu1 %vm123_vm0, %v241_v8 }
  0x55   :  { %595 = vmatprep.subr.msk.mxu1 %vm123_vm0, %v240_v10  ;;  %p751_p6 = pnand %p750_p5, %p744_p2 }
  0x57   :  { %585 = vmatpush3.xpose.msk.msra.mxu0 %vm123_vm0, %v134_v9 }
  0x58   :  { %600 = vmatprep.subr.msk.mxu0 %vm123_vm0, %v348_v11  ;;  %596 = vmatpush3.xpose.msk.msra.mxu1 %vm123_vm0, %v240_v10 }
  0x5a   :  { %587 = vmatmul.mubr.msk.f32.vlgmr.msra.gmra.mxu0 %vm123_vm0, %v133_v12 }
  0x5b   :  { %601 = vmatpush3.xpose.msk.msra.mxu0 %vm123_vm0, %v348_v11  ;;  %598 = vmatmul.mubr.msk.f32.vlgmr.msra.gmra.mxu1 %vm123_vm0, %v239_v13 }
  0x5c   :  { %602 = vmatprep.subr.msk.mxu0 %vm123_vm0, %v347_v14  ;;  %608 = vmatprep.mubr.msk.f32.mxu0 %vm123_vm0, %v343_v15 }
  0x5f   :  { %603 = vmatpush3.xpose.msk.msra.mxu0 %vm123_vm0, %v347_v14 }
  0x60   :  { %604 = vmatprep.subr.msk.mxu0 %vm123_vm0, %v346_v16 }
  0x63   :  { %605 = vmatpush3.xpose.msk.msra.mxu0 %vm123_vm0, %v346_v16 }
  0x64   :  { %606 = vmatprep.subr.msk.mxu0 %vm123_vm0, %v345_v17 }
  0x67   :  { %607 = vmatpush3.xpose.msk.msra.mxu0 %vm123_vm0, %v345_v17 }
  0x6a   :  { %609 = vmatmul.mubr.msk.f32.vlgmr.msra.gmra.mxu0 %vm123_vm0, %v344_v18 }
 0x11a   :  { %v588_v21 = vpop.f32.mrf.mxu0 }
 0x11b   :  { %v233_v23 = vadd.f32 %v588_v21, %v131_v19  ;;  %v599_v24 = vpop.f32.mrf.mxu1 }
 0x11c   :  { %v223_v26 = vpop.f32.mrf.mxu0  ;;  %v338_v27 = vadd.f32 %v599_v24, %v237_v20 }
 0x11d   :  { %235 = vst.msk [vmem:[#allocation2 + $0x8] sm:$0xff] %vm123_vm0, %v233_v23  ;;  %v232_v28 = vadd.f32 %v223_v26, %v130_v22  ;;  %v328_v29 = vpop.f32.mrf.mxu1 }
 0x11e   :  { %340 = vst.msk [vmem:[#allocation3 + $0x8] sm:$0xff] %vm123_vm0, %v338_v27  ;;  %v337_v30 = vadd.f32 %v328_v29, %v236_v25 }
 0x11f   :  { %234 = vst.msk [vmem:[#allocation2] sm:$0xff] %vm123_vm0, %v232_v28 }
 0x120   :  { %339 = vst.msk [vmem:[#allocation3] sm:$0xff] %vm123_vm0, %v337_v30 }
 0x124   :  { %v450_v33 = vld [vmem:[#allocation2 + $0x8] sm:$0xff] }
 0x125   :  { %v463_v34 = vld [vmem:[#allocation3 + $0x8] sm:$0xff]  ;;  %v459_v35 = vadd.f32 %v557_v31, %v450_v33 }
 0x126   :  { %v472_v36 = vadd.f32 %v558_v32, %v463_v34  ;;  %v449_v37 = vld [vmem:[#allocation2] sm:$0xff] }
 0x127   :  { %v462_v38 = vld [vmem:[#allocation3] sm:$0xff]  ;;  %v458_v39 = vadd.f32 %v557_v31, %v449_v37  ;;  %461 = vst.msk [vmem:[#allocation16 + $0x8] sm:$0xff] %vm123_vm0, %v459_v35 }
 0x128   :  { %v471_v41 = vadd.f32 %v558_v32, %v462_v38  ;;  %474 = vst.msk [vmem:[#allocation17 + $0x8] sm:$0xff] %vm123_vm0, %v472_v36 }
 0x129   :  { %460 = vst.msk [vmem:[#allocation16] sm:$0xff] %vm123_vm0, %v458_v39 }
 0x12a   :  { %v610_v42 = vpop.f32.mrf.mxu0  ;;  %473 = vst.msk [vmem:[#allocation17] sm:$0xff] %vm123_vm0, %v471_v41 }
 0x12b   :  { %754 = shalt.err (!%p751_p6)
}
 0x12c   :  { %499 = dma.vmem_to_hbm [thread:$0]  %s494_s12, 256, %s1007_s9, [#allocation7], %s817_s22, %s817_s22, %s818_s23   ;;  %v443_v44 = vadd.f32 %v610_v42, %v342_v40 }
 0x12d   :  { %s763_s15 = scalar_lea.vmem %s506_s1, 256  ;;  %p768_p8 = scmp.lt.s32.totalorder %s506_s1, %s506_s1 }
 0x12e   :  { %p764_p7 = scmp.ne.s32.totalorder %s506_s1, %s763_s15  ;;  %p769_p9 = scmp.lt.s32.totalorder %s763_s15, %s763_s15 }
 0x130   :  { %p770_p10 = por %p769_p9, %p768_p8 }
 0x132   :  { %p771_p11 = pnand %p770_p10, %p764_p7 }
 0x134   :  { %774 = shalt.err (!%p771_p11)
}
 0x135   :  { %511 = dma.vmem_to_hbm [thread:$0]  %s506_s1, 256, %s1008_s10, [#allocation18], %s817_s22, %s817_s22, %s818_s23   ;;  %v433_v45 = vpop.f32.mrf.mxu0  ;;  %445 = vst.msk [vmem:[#allocation4 + $0x8] sm:$0xff] %vm123_vm0, %v443_v44 }
 0x136   :  { %v442_v46 = vadd.f32 %v433_v45, %v341_v43  ;;  %v559_v47 = vld [vmem:[%s1006_s8] ss:$0 sm:$0xff]  ;;  %s826_s18 = smov [#allocation19]  }
 0x137   :  { %s517_s19 = sshll.u32 %s826_s18, 4  ;;  %s518_s19 = int_to_ptr.vmem [resolvable:$true] %s517_s19 }
 0x138   :  { %444 = vst.msk [vmem:[#allocation4] sm:$0xff] %vm123_vm0, %v442_v46  ;;  %s783_s10 = scalar_lea.vmem %s518_s19, 256  ;;  %p788_p13 = scmp.lt.s32.totalorder %s518_s19, %s518_s19 }
 0x139   :  { %p784_p12 = scmp.ne.s32.totalorder %s518_s19, %s783_s10  ;;  %p789_p0 = scmp.lt.s32.totalorder %s783_s10, %s783_s10 }
 0x13b   :  { %p790_p1 = por %p789_p0, %p788_p13 }
 0x13c   :  { %v476_v48 = vld [vmem:[#allocation4 + $0x8] sm:$0xff] }
 0x13d   :  { %v485_v49 = vadd.f32 %v559_v47, %v476_v48  ;;  %p791_p2 = pnand %p790_p1, %p784_p12 }
 0x13f   :  { %v475_v50 = vld [vmem:[#allocation4] sm:$0xff]  ;;  %487 = vst.msk [vmem:[#allocation19 + $0x8] sm:$0xff] %vm123_vm0, %v485_v49 }
 0x140   :  { %v484_v51 = vadd.f32 %v559_v47, %v475_v50 }
 0x142   :  { %486 = vst.msk [vmem:[#allocation19] sm:$0xff] %vm123_vm0, %v484_v51 }
 0x143   :  { %794 = shalt.err (!%p791_p2)
}
 0x144   :  { %523 = dma.vmem_to_hbm [thread:$0]  %s518_s19, 256, %s1009_s11, [#allocation18], %s817_s22, %s817_s22, %s818_s23  }
 0x145   :  { %811 = dma.done.wait [#allocation7], 256  }
 0x146   :  { %812 = vsyncadd [#allocation7], 4294967040 }
 0x147   :  { %813 = dma.done.wait [#allocation18], 512  }
 0x148   :  { %814 = vsyncadd [#allocation18], 4294966784 }
 0x149   :  { %533 = vsyncpa [#allocation6], 1 }
 0x14a   :  { %534 = vsyncpa [#allocation9], 1 }
 0x14b   :  { %535 = vsyncpa [#allocation12], 1 }
 0x14c   :  { %536 = vsyncpa [#allocation15], 1 }
 0x14d   :  { %537 = vsyncpa [#allocation7], 1 }
 0x14e   :  { %538 = vsyncpa [#allocation18], 1 }

</bundles_post_ra>
